<compile_context>
chip_gen: v6e
topology: v6e:2x2x1
jax: 0.10.0
libtpu: 0.0.40
codegen_flags: <defaults>
</compile_context>

<pallas_src>
import jax
import jax.numpy as jnp
from jax import lax
from jax.experimental import pallas as pl
from jax.experimental.pallas import tpu as pltpu

_LANES = 128
_SUBLANES = 8


def _angle_loss_kernel(y_ref, x_ref, t_ref, cos_out_ref, sq_out_ref,
                       acc_cos, acc_sq):
    c = pl.program_id(1)

    @pl.when(c == 0)
    def _init():
        acc_cos[...] = jnp.zeros_like(acc_cos)
        acc_sq[...] = jnp.zeros_like(acc_sq)

    y = y_ref[...]                      # (TR, 128)
    x = x_ref[...]                      # (TR, 128)
    t = t_ref[...]                      # (TR, 128)

    ct = jnp.cos(t)                     # fused in-kernel (EUP/VPU), saves 2 streams
    st = jnp.sin(t)

    r2 = x * x + y * y
    nz = r2 > 0.0
    inv_r = lax.rsqrt(jnp.where(nz, r2, 1.0))     # EUP slot; safe at r2 == 0
    r = r2 * inv_r                                # = sqrt(r2); exactly 0 at r2 == 0
    # cos(atan2(y, x) - t) == (x*cos t + y*sin t) / r; reference gives cos(t) at origin
    # because arctan2(0, 0) == 0.
    cos_diff = jnp.where(nz, (x * ct + y * st) * inv_r, ct)
    sq = (r - 1.0) ** 2

    tr = y.shape[0]
    if tr == _SUBLANES:
        part_cos = cos_diff
        part_sq = sq
    else:
        # Cross-vreg VPU adds only (no per-step full XLU reduce); the (8,128)
        # tiles stay intact through this reshape.
        part_cos = jnp.sum(cos_diff.reshape(tr // _SUBLANES, _SUBLANES, _LANES), axis=0)
        part_sq = jnp.sum(sq.reshape(tr // _SUBLANES, _SUBLANES, _LANES), axis=0)

    acc_cos[...] += part_cos
    acc_sq[...] += part_sq

    @pl.when(c == pl.num_programs(1) - 1)
    def _finalize():
        cos_out_ref[...] = acc_cos[...][None, :, :]
        sq_out_ref[...] = acc_sq[...][None, :, :]


def angle_loss(inp, target, magnitude_regulariser_weight: float = 0.01,
               *, tile_rows: int = 512, num_cores: int = 2):
    B = inp.shape[0]
    assert inp.shape == (B, 2)
    assert target.shape == (B, 1)

    inp32 = inp.astype(jnp.float32)
    t32 = target.astype(jnp.float32)[:, 0]

    # TODO(synk): arctan2 has no reliable Mosaic lowering; the per-element
    # auxiliary `angles` output is computed as plain-JAX glue.  All loss
    # reductions run in the Pallas kernel.
    angles = jnp.arctan2(inp32[:, 0], inp32[:, 1])

    # ---- lane-dense padded layout --------------------------------------
    rows_needed = pl.cdiv(B, _LANES)
    rows_rounded = ((rows_needed + _SUBLANES - 1) // _SUBLANES) * _SUBLANES
    tile_rows_eff = min(tile_rows, rows_rounded)
    tile_rows_eff = max(_SUBLANES, (tile_rows_eff // _SUBLANES) * _SUBLANES)
    total_chunks = pl.cdiv(rows_rounded, tile_rows_eff)
    num_par = max(1, min(num_cores, total_chunks))       # megacore split (v7x)
    chunks_per_par = pl.cdiv(total_chunks, num_par)
    rows_padded = num_par * chunks_per_par * tile_rows_eff
    padded_B = rows_padded * _LANES
    n_pad = padded_B - B

    # Padded rows use (y, x, t) = (0, 1, 0): cos term contributes exactly 1.0
    # (subtracted below) and the magnitude term contributes exactly 0.0.
    y2 = jnp.pad(inp32[:, 0], (0, n_pad), constant_values=0.0).reshape(rows_padded, _LANES)
    x2 = jnp.pad(inp32[:, 1], (0, n_pad), constant_values=1.0).reshape(rows_padded, _LANES)
    t2 = jnp.pad(t32, (0, n_pad), constant_values=0.0).reshape(rows_padded, _LANES)

    in_map = lambda p, c: (p * chunks_per_par + c, 0)
    out_map = lambda p, c: (p, 0, 0)

    cost = pl.CostEstimate(
        flops=16 * padded_B,
        transcendentals=3 * padded_B,
        bytes_accessed=3 * 4 * padded_B + 2 * num_par * _SUBLANES * _LANES * 4,
    )

    cos_part, sq_part = pl.pallas_call(
        _angle_loss_kernel,
        out_shape=(
            jax.ShapeDtypeStruct((num_par, _SUBLANES, _LANES), jnp.float32),
            jax.ShapeDtypeStruct((num_par, _SUBLANES, _LANES), jnp.float32),
        ),
        grid_spec=pltpu.PrefetchScalarGridSpec(
            num_scalar_prefetch=0,
            grid=(num_par, chunks_per_par),
            in_specs=[
                pl.BlockSpec((tile_rows_eff, _LANES), in_map),
                pl.BlockSpec((tile_rows_eff, _LANES), in_map),
                pl.BlockSpec((tile_rows_eff, _LANES), in_map),
            ],
            out_specs=(
                pl.BlockSpec((1, _SUBLANES, _LANES), out_map),
                pl.BlockSpec((1, _SUBLANES, _LANES), out_map),
            ),
            scratch_shapes=[
                pltpu.VMEM((_SUBLANES, _LANES), jnp.float32),
                pltpu.VMEM((_SUBLANES, _LANES), jnp.float32),
            ],
        ),
        compiler_params=pltpu.CompilerParams(
            dimension_semantics=("parallel", "arbitrary")),
        cost_estimate=cost,
    )(y2, x2, t2)

    sum_cos = jnp.sum(cos_part) - jnp.float32(n_pad)   # remove exact pad contributions
    dec_loss = 1.0 - sum_cos / jnp.float32(B)
    if magnitude_regulariser_weight > 0:
        mag_loss = magnitude_regulariser_weight * (jnp.sum(sq_part) / jnp.float32(B))
    else:
        mag_loss = jnp.float32(0.0)
    return {"dec_loss": dec_loss, "mag_loss": mag_loss, "angles": angles}


def _reference(inp, target, w=0.01):
    angles = jnp.arctan2(inp[:, 0], inp[:, 1])
    dec = 1.0 - jnp.mean(jnp.cos(angles - target[:, 0]))
    mags = jnp.sqrt(inp[:, 0] ** 2 + inp[:, 1] ** 2)
    mag = w * jnp.mean((mags - 1.0) ** 2)
    return dec, mag, angles


if __name__ == "__main__":
    key = jax.random.PRNGKey(0)
    k1, k2 = jax.random.split(key)
    B = 64
    inp = jax.random.normal(k1, (B, 2), dtype=jnp.float32)
    target = jax.random.uniform(
        k2, (B, 1), dtype=jnp.float32, minval=-jnp.pi, maxval=jnp.pi)

    out = angle_loss(inp, target, magnitude_regulariser_weight=0.01)
    jax.block_until_ready(out)

    dec_ref, mag_ref, ang_ref = _reference(inp, target)
    assert jnp.allclose(out["dec_loss"], dec_ref, atol=1e-4), (out["dec_loss"], dec_ref)
    assert jnp.allclose(out["mag_loss"], mag_ref, atol=1e-4), (out["mag_loss"], mag_ref)
    assert jnp.allclose(out["angles"], ang_ref, atol=1e-5)

    # A second, zero-weight / ragged-batch sanity check (exercises padding path).
    B2 = 50
    inp2 = jax.random.normal(k2, (B2, 2), dtype=jnp.float32)
    tgt2 = jax.random.uniform(k1, (B2, 1), dtype=jnp.float32, minval=-jnp.pi, maxval=jnp.pi)
    out2 = angle_loss(inp2, tgt2, magnitude_regulariser_weight=0.0)
    jax.block_until_ready(out2)
    dec2, _, _ = _reference(inp2, tgt2, w=0.0)
    assert jnp.allclose(out2["dec_loss"], dec2, atol=1e-4)
    assert float(out2["mag_loss"]) == 0.0

    print("KERNEL_OK")
</pallas_src>

<mosaic_0001>
module attributes {stable_mosaic.version = 11 : i64} {
  func.func @_angle_loss_kernel(%arg0: i32, %arg1: i32, %arg2: memref<8x128xf32, #tpu.memory_space<vmem>>, %arg3: memref<8x128xf32, #tpu.memory_space<vmem>>, %arg4: memref<8x128xf32, #tpu.memory_space<vmem>>, %arg5: memref<1x8x128xf32, #tpu.memory_space<vmem>>, %arg6: memref<1x8x128xf32, #tpu.memory_space<vmem>>, %arg7: memref<8x128xf32, #tpu.memory_space<vmem>>, %arg8: memref<8x128xf32, #tpu.memory_space<vmem>>) attributes {dimension_semantics = [#tpu.dimension_semantics<parallel>, #tpu.dimension_semantics<arbitrary>], iteration_bounds = array<i64: 1, 1>, scalar_prefetch = 0 : i64, scratch_operands = 2 : i64, tpu.core_type = #tpu.core_type<tc>, window_params = [{transform_indices = @transform_0, window_bounds = array<i64: 8, 128>}, {transform_indices = @transform_1, window_bounds = array<i64: 8, 128>}, {transform_indices = @transform_2, window_bounds = array<i64: 8, 128>}, {transform_indices = @transform_3, window_bounds = array<i64: 1, 8, 128>}, {transform_indices = @transform_4, window_bounds = array<i64: 1, 8, 128>}]} {
    %c0_i32 = arith.constant 0 : i32
    %0 = arith.cmpi eq, %arg1, %c0_i32 : i32
    %1 = arith.extui %0 : i1 to i32
    %c0_i32_0 = arith.constant 0 : i32
    %2 = arith.cmpi ne, %1, %c0_i32_0 : i32
    scf.if %2 {
      %cst_18 = arith.constant 0.000000e+00 : f32
      %34 = vector.broadcast %cst_18 : f32 to vector<8x128xf32>
      %c0_19 = arith.constant 0 : index
      %c0_20 = arith.constant 0 : index
      %35 = vector.load %arg7[%c0_19, %c0_20] : memref<8x128xf32, #tpu.memory_space<vmem>>, vector<8x128xf32>
      tpu.vector_store %arg7[%c0_19, %c0_20], %34 {strides = array<i32>} : memref<8x128xf32, #tpu.memory_space<vmem>>, vector<8x128xf32>,
      %cst_21 = arith.constant 0.000000e+00 : f32
      %36 = vector.broadcast %cst_21 : f32 to vector<8x128xf32>
      %c0_22 = arith.constant 0 : index
      %c0_23 = arith.constant 0 : index
      %37 = vector.load %arg8[%c0_22, %c0_23] : memref<8x128xf32, #tpu.memory_space<vmem>>, vector<8x128xf32>
      tpu.vector_store %arg8[%c0_22, %c0_23], %36 {strides = array<i32>} : memref<8x128xf32, #tpu.memory_space<vmem>>, vector<8x128xf32>,
    } else {
    }
    %c0 = arith.constant 0 : index
    %c0_1 = arith.constant 0 : index
    %3 = vector.load %arg2[%c0, %c0_1] : memref<8x128xf32, #tpu.memory_space<vmem>>, vector<8x128xf32>
    %c0_2 = arith.constant 0 : index
    %c0_3 = arith.constant 0 : index
    %4 = vector.load %arg3[%c0_2, %c0_3] : memref<8x128xf32, #tpu.memory_space<vmem>>, vector<8x128xf32>
    %c0_4 = arith.constant 0 : index
    %c0_5 = arith.constant 0 : index
    %5 = vector.load %arg4[%c0_4, %c0_5] : memref<8x128xf32, #tpu.memory_space<vmem>>, vector<8x128xf32>
    %6 = math.cos %5 : vector<8x128xf32>
    %7 = math.sin %5 : vector<8x128xf32>
    %8 = arith.mulf %4, %4 : vector<8x128xf32>
    %9 = arith.mulf %3, %3 : vector<8x128xf32>
    %10 = arith.addf %8, %9 : vector<8x128xf32>
    %cst = arith.constant 0.000000e+00 : f32
    %11 = vector.broadcast %cst : f32 to vector<8x128xf32>
    %12 = arith.cmpf ogt, %10, %11 : vector<8x128xf32>
    %cst_6 = arith.constant 1.000000e+00 : f32
    %13 = vector.broadcast %cst_6 : f32 to vector<8x128xf32>
    %14 = arith.select %12, %10, %13 : vector<8x128xi1>, vector<8x128xf32>
    %15 = math.rsqrt %14 : vector<8x128xf32>
    %16 = arith.mulf %10, %15 : vector<8x128xf32>
    %17 = arith.mulf %4, %6 : vector<8x128xf32>
    %18 = arith.mulf %3, %7 : vector<8x128xf32>
    %19 = arith.addf %17, %18 : vector<8x128xf32>
    %20 = arith.mulf %19, %15 : vector<8x128xf32>
    %21 = arith.select %12, %20, %6 : vector<8x128xi1>, vector<8x128xf32>
    %cst_7 = arith.constant 1.000000e+00 : f32
    %22 = vector.broadcast %cst_7 : f32 to vector<8x128xf32>
    %23 = arith.subf %16, %22 : vector<8x128xf32>
    %24 = arith.mulf %23, %23 : vector<8x128xf32>
    %c0_8 = arith.constant 0 : index
    %c0_9 = arith.constant 0 : index
    %25 = vector.load %arg7[%c0_8, %c0_9] : memref<8x128xf32, #tpu.memory_space<vmem>>, vector<8x128xf32>
    %26 = arith.addf %25, %21 : vector<8x128xf32>
    %c0_10 = arith.constant 0 : index
    %c0_11 = arith.constant 0 : index
    %27 = vector.load %arg7[%c0_10, %c0_11] : memref<8x128xf32, #tpu.memory_space<vmem>>, vector<8x128xf32>
    tpu.vector_store %arg7[%c0_10, %c0_11], %26 {strides = array<i32>} : memref<8x128xf32, #tpu.memory_space<vmem>>, vector<8x128xf32>,
    %c0_12 = arith.constant 0 : index
    %c0_13 = arith.constant 0 : index
    %28 = vector.load %arg8[%c0_12, %c0_13] : memref<8x128xf32, #tpu.memory_space<vmem>>, vector<8x128xf32>
    %29 = arith.addf %28, %24 : vector<8x128xf32>
    %c0_14 = arith.constant 0 : index
    %c0_15 = arith.constant 0 : index
    %30 = vector.load %arg8[%c0_14, %c0_15] : memref<8x128xf32, #tpu.memory_space<vmem>>, vector<8x128xf32>
    tpu.vector_store %arg8[%c0_14, %c0_15], %29 {strides = array<i32>} : memref<8x128xf32, #tpu.memory_space<vmem>>, vector<8x128xf32>,
    %c0_i32_16 = arith.constant 0 : i32
    %31 = arith.cmpi eq, %arg1, %c0_i32_16 : i32
    %32 = arith.extui %31 : i1 to i32
    %c0_i32_17 = arith.constant 0 : i32
    %33 = arith.cmpi ne, %32, %c0_i32_17 : i32
    scf.if %33 {
      %c0_18 = arith.constant 0 : index
      %c0_19 = arith.constant 0 : index
      %34 = vector.load %arg7[%c0_18, %c0_19] : memref<8x128xf32, #tpu.memory_space<vmem>>, vector<8x128xf32>
      %35 = vector.shape_cast %34 : vector<8x128xf32> to vector<1x8x128xf32>
      %c0_20 = arith.constant 0 : index
      %c0_21 = arith.constant 0 : index
      %c0_22 = arith.constant 0 : index
      %36 = vector.load %arg5[%c0_20, %c0_21, %c0_22] : memref<1x8x128xf32, #tpu.memory_space<vmem>>, vector<1x8x128xf32>
      tpu.vector_store %arg5[%c0_20, %c0_21, %c0_22], %35 {strides = array<i32>} : memref<1x8x128xf32, #tpu.memory_space<vmem>>, vector<1x8x128xf32>,
      %c0_23 = arith.constant 0 : index
      %c0_24 = arith.constant 0 : index
      %37 = vector.load %arg8[%c0_23, %c0_24] : memref<8x128xf32, #tpu.memory_space<vmem>>, vector<8x128xf32>
      %38 = vector.shape_cast %37 : vector<8x128xf32> to vector<1x8x128xf32>
      %c0_25 = arith.constant 0 : index
      %c0_26 = arith.constant 0 : index
      %c0_27 = arith.constant 0 : index
      %39 = vector.load %arg6[%c0_25, %c0_26, %c0_27] : memref<1x8x128xf32, #tpu.memory_space<vmem>>, vector<1x8x128xf32>
      tpu.vector_store %arg6[%c0_25, %c0_26, %c0_27], %38 {strides = array<i32>} : memref<1x8x128xf32, #tpu.memory_space<vmem>>, vector<1x8x128xf32>,
    } else {
    }
    return
  }
  func.func @transform_0(%arg0: i32, %arg1: i32) -> (i32, i32) {
    %c1_i32 = arith.constant 1 : i32
    %0 = arith.muli %arg0, %c1_i32 : i32
    %1 = arith.addi %0, %arg1 : i32
    %c0_i32 = arith.constant 0 : i32
    %c0_i32_0 = arith.constant 0 : i32
    return %1, %c0_i32 : i32, i32
  }
  func.func @transform_1(%arg0: i32, %arg1: i32) -> (i32, i32) {
    %c1_i32 = arith.constant 1 : i32
    %0 = arith.muli %arg0, %c1_i32 : i32
    %1 = arith.addi %0, %arg1 : i32
    %c0_i32 = arith.constant 0 : i32
    %c0_i32_0 = arith.constant 0 : i32
    return %1, %c0_i32 : i32, i32
  }
  func.func @transform_2(%arg0: i32, %arg1: i32) -> (i32, i32) {
    %c1_i32 = arith.constant 1 : i32
    %0 = arith.muli %arg0, %c1_i32 : i32
    %1 = arith.addi %0, %arg1 : i32
    %c0_i32 = arith.constant 0 : i32
    %c0_i32_0 = arith.constant 0 : i32
    return %1, %c0_i32 : i32, i32
  }
  func.func @transform_3(%arg0: i32, %arg1: i32) -> (i32, i32, i32) {
    %c0_i32 = arith.constant 0 : i32
    %c0_i32_0 = arith.constant 0 : i32
    %c0_i32_1 = arith.constant 0 : i32
    return %arg0, %c0_i32, %c0_i32_0 : i32, i32, i32
  }
  func.func @transform_4(%arg0: i32, %arg1: i32) -> (i32, i32, i32) {
    %c0_i32 = arith.constant 0 : i32
    %c0_i32_0 = arith.constant 0 : i32
    %c0_i32_1 = arith.constant 0 : i32
    return %arg0, %c0_i32, %c0_i32_0 : i32, i32, i32
  }
}

</mosaic_0001>

<bundles_post_ra>
// kernel: tpu_custom_call.1
= control target key start
LH: loop header
LB: loop body
LE: loop exit
PB: predicated region body
PF: predicated region fallthrough
CT: control target
= control target key end

     0   :  { %10 = vsyncpa [#allocation5], 0  ;;  %s571_s0 = inlined_call_operand.hbm [shape: f32[8,128], index: 0, kind: input, shape index: {}]   ;;  %s572_s1 = inlined_call_operand.hbm [shape: f32[8,128], index: 1, kind: input, shape index: {}]   ;;  %s573_s2 = inlined_call_operand.hbm [shape: f32[8,128], index: 2, kind: input, shape index: {}]   ;;  %s574_s3 = inlined_call_operand.hbm [shape: f32[1,8,128], index: 3, kind: output, shape index: {0}]   ;;  %s575_s4 = inlined_call_operand.hbm [shape: f32[1,8,128], index: 4, kind: output, shape index: {1}]  }
   0x1   :  { %11 = vsyncpa [#allocation8], 0 }
   0x2   :  { %12 = vsyncpa [#allocation6], 0 }
   0x3   :  { %13 = vsyncpa [#allocation12], 0  ;;  %s476_s15 = smov [#allocation7]   ;;  %s477_s17 = smov [#allocation4]  }
   0x4   :  { %s36_s16 = sshll.u32 %s476_s15, 4  ;;  %s23_s18 = sshll.u32 %s477_s17, 4  ;;  %s37_s16 = int_to_ptr.vmem [resolvable:$true] %s36_s16  ;;  %s24_s18 = int_to_ptr.vmem [resolvable:$true] %s23_s18 }
   0x5   :  { %s376_s19 = scalar_lea.vmem %s37_s16, 128  ;;  %p381_p1 = scmp.lt.s32.totalorder %s37_s16, %s37_s16 }
   0x6   :  { %p377_p0 = scmp.ne.s32.totalorder %s37_s16, %s376_s19  ;;  %p382_p2 = scmp.lt.s32.totalorder %s376_s19, %s376_s19 }
   0x8   :  { %p383_p3 = por %p382_p2, %p381_p1 }
   0xa   :  { %p384_p4 = pnand %p383_p3, %p377_p0 }
   0xc   :  { %387 = shalt.err (!%p384_p4)
}
   0xd   :  { %39 = dma.hbm_to_vmem [thread:$0]  %s572_s1, 128, %s37_s16, [#allocation8]  }
   0xe   :  { %s396_s22 = scalar_lea.vmem %s24_s18, 128  ;;  %p401_p6 = scmp.lt.s32.totalorder %s24_s18, %s24_s18 }
   0xf   :  { %p397_p5 = scmp.ne.s32.totalorder %s24_s18, %s396_s22  ;;  %p402_p7 = scmp.lt.s32.totalorder %s396_s22, %s396_s22 }
  0x11   :  { %p403_p8 = por %p402_p7, %p401_p6 }
  0x13   :  { %p404_p9 = pnand %p403_p8, %p397_p5 }
  0x15   :  { %407 = shalt.err (!%p404_p9)
}
  0x16   :  { %26 = dma.hbm_to_vmem [thread:$0]  %s571_s0, 128, %s24_s18, [#allocation5]  }
  0x17   :  { %s478_s25 = smov [#allocation9]  }
  0x18   :  { %s49_s26 = sshll.u32 %s478_s25, 4  ;;  %s50_s26 = int_to_ptr.vmem [resolvable:$true] %s49_s26 }
  0x19   :  { %s416_s27 = scalar_lea.vmem %s50_s26, 128  ;;  %p421_p11 = scmp.lt.s32.totalorder %s50_s26, %s50_s26 }
  0x1a   :  { %p417_p10 = scmp.ne.s32.totalorder %s50_s26, %s416_s27  ;;  %p422_p12 = scmp.lt.s32.totalorder %s416_s27, %s416_s27 }
  0x1c   :  { %p423_p13 = por %p422_p12, %p421_p11 }
  0x1e   :  { %p424_p0 = pnand %p423_p13, %p417_p10 }
  0x20   :  { %427 = shalt.err (!%p424_p0)
}
  0x21   :  { %52 = dma.hbm_to_vmem [thread:$0]  %s573_s2, 128, %s50_s26, [#allocation8]  }
  0x22   :  { %468 = dma.done.wait [#allocation5], 128  }
  0x23   :  { %469 = vsyncadd [#allocation5], 4294967168 }
  0x24   :  { %470 = dma.done.wait [#allocation8], 256  }
  0x25   :  { %471 = vsyncadd [#allocation8], 4294967040  ;;  %v521_v0 = vld [vmem:[#allocation4] sm:$0xff]  ;;  %v523_v1 = vld [vmem:[#allocation7] sm:$0xff]  ;;  %v479_v18 = vmov 683565275  }
  0x26   :  { %v525_v2 = vld [vmem:[#allocation9] sm:$0xff]  ;;  %v281_v4 = vmul.f32 %v523_v1, %v523_v1  ;;  %v282_v5 = vmul.f32 %v521_v0, %v521_v0  ;;  %v480_v20 = vmov 2475754826   ;;  %v481_v22 = vmov 2131351028   ;;  %s485_s0 = smov [#allocation11]  }
  0x27   :  { %v77_v3 = vand.u32 2139095040, %v525_v2  ;;  %v74_v7 = vand.u32 2147483647, %v525_v2  ;;  %v482_v24 = vmov 2102212464   ;;  %s324_s2 = sshll.u32 %s485_s0, 4  ;;  %s325_s2 = int_to_ptr.vmem [resolvable:$true] %s324_s2 }
  0x28   :  { %v533_v8 = vadd.f32 %v282_v5, %v281_v4  ;;  %v483_v26 = vmov 920167782   ;;  %v484_v33 = vmov 1326507024   ;;  %s428_s29 = scalar_lea.vmem %s325_s2, 128  ;;  %p433_p2 = scmp.lt.s32.totalorder %s325_s2, %s325_s2 }
  0x29   :  { %v78_v6 = vshrl.u32 %v77_v3, 23  ;;  %v81_v12 = vand.u32 8388607, %v74_v7  ;;  %p429_p1 = scmp.ne.s32.totalorder %s325_s2, %s428_s29  ;;  %p434_p3 = scmp.lt.s32.totalorder %s428_s29, %s428_s29 }
  0x2a   :  { %vm284_vm0 = vcmp.gt.f32.partialorder %v533_v8, 0.0 }
  0x2b   :  { %v338_v9 = vadd.s32 4294967169, %v78_v6  ;;  %v285_v11 = vsel %vm284_vm0, %v533_v8, 1.0  ;;  %v82_v15 = vor.u32 8388608, %v81_v12  ;;  %p435_p4 = por %p434_p3, %p433_p2 }
  0x2c   :  { %362 = vrsqrt.f32 %v285_v11 }
  0x2d   :  { %v84_v10 = vadd.s32 1, %v338_v9  ;;  %v122_v35 = vshll.u32 %v82_v15, 8  ;;  %p436_p5 = pnand %p435_p4, %p429_p1 }
  0x2f   :  { %vm85_vm1 = vcmp.gt.s32.totalorder %v84_v10, 0 }
  0x30   :  { %v86_v13 = vsel %vm85_vm1, %v84_v10, 0 }
  0x31   :  { %v88_v14 = vand.u32 31, %v86_v13  ;;  %v87_v16 = vshrl.u32 %v86_v13, 5 }
  0x33   :  { %v89_v17 = vsub.s32 32, %v88_v14  ;;  %v91_v19 = vshll.u32 %v479_v18, %v88_v14  ;;  %v94_v21 = vshll.u32 %v480_v20, %v88_v14  ;;  %v97_v23 = vshll.u32 %v481_v22, %v88_v14 }
  0x34   :  { %v100_v25 = vshll.u32 %v482_v24, %v88_v14  ;;  %v103_v27 = vshll.u32 %v483_v26, %v88_v14  ;;  %vm106_vm2 = vcmp.lt.s32.totalorder %v87_v16, 1  ;;  %vm109_vm3 = vcmp.lt.s32.totalorder %v87_v16, 4 }
  0x35   :  { %v90_v28 = vshrl.u32 %v479_v18, %v89_v17  ;;  %v92_v29 = vshrl.u32 %v480_v20, %v89_v17  ;;  %v95_v30 = vshrl.u32 %v481_v22, %v89_v17  ;;  %v98_v31 = vshrl.u32 %v482_v24, %v89_v17 }
  0x36   :  { %v101_v32 = vshrl.u32 %v483_v26, %v89_v17  ;;  %v104_v34 = vshrl.u32 %v484_v33, %v89_v17  ;;  %vm107_vm4 = vcmp.lt.s32.totalorder %v87_v16, 2  ;;  %vm108_vm5 = vcmp.lt.s32.totalorder %v87_v16, 3 }
  0x37   :  { %v93_v36 = vor.u32 %v92_v29, %v91_v19  ;;  %v96_v37 = vor.u32 %v95_v30, %v94_v21  ;;  %v99_v38 = vor.u32 %v98_v31, %v97_v23 }
  0x38   :  { %v102_v39 = vor.u32 %v101_v32, %v100_v25  ;;  %v105_v40 = vor.u32 %v104_v34, %v103_v27 }
  0x39   :  { %v110_v41 = vsel %vm106_vm2, %v90_v28, %v93_v36  ;;  %v111_v42 = vsel %vm109_vm3, %v99_v38, 2102212464  ;;  %v114_v43 = vsel %vm106_vm2, %v93_v36, %v96_v37  ;;  %v118_v44 = vsel %vm106_vm2, %v96_v37, %v99_v38  ;;  %v541_v48 = vpop.eup %362 }
  0x3a   :  { %v112_v45 = vsel %vm108_vm5, %v96_v37, %v111_v42  ;;  %v115_v46 = vsel %vm109_vm3, %v102_v39, 920167782  ;;  %v119_v47 = vsel %vm109_vm3, %v105_v40, 1326507024  ;;  %v287_v54 = vmul.f32 %v541_v48, %v533_v8 }
  0x3b   :  { %v116_v49 = vsel %vm108_vm5, %v99_v38, %v115_v46  ;;  %v120_v50 = vsel %vm108_vm5, %v102_v39, %v119_v47  ;;  %v113_v51 = vsel %vm107_vm4, %v110_v41, %v112_v45 }
  0x3c   :  { %v117_v52 = vsel %vm107_vm4, %v114_v43, %v116_v49  ;;  %v121_v53 = vsel %vm107_vm4, %v118_v44, %v120_v50  ;;  %v346_v59 = vadd.f32 -1.0, %v287_v54  ;;  %v129_v60 = vmul.u32 %v122_v35, %v113_v51 }
  0x3d   :  { %v545_v55 = vmul.u32.u64.low %v122_v35, %v121_v53  ;;  %v546_v56 = vmul.u32.u64.high %v122_v35, %v121_v53, %v545_v55  ;;  %v548_v57 = vmul.u32.u64.low %v122_v35, %v117_v52  ;;  %v549_v58 = vmul.u32.u64.high %v122_v35, %v117_v52, %v548_v57 }
  0x3e   :  { %v294_v61 = vmul.f32 %v346_v59, %v346_v59 }
  0x3f   :  { %vm131_vm6 = vc.u32 %v546_v56, %v548_v57  ;;  %v132_v62 = vadd.s32 1, %v549_v58 }
  0x40   :  { %307 = vst [vmem:[#allocation11] sm:$0xff] %v294_v61 }
  0x41   :  { %v133_v63 = vsel %vm131_vm6, %v132_v62, %v549_v58 }
  0x42   :  { %439 = shalt.err (!%p436_p5)
}
  0x43   :  { %327 = dma.vmem_to_hbm [thread:$0]  %s325_s2, 128, %s575_s4, [#allocation12]   ;;  %v134_v3 = vadd.s32 %v133_v63, %v129_v60  ;;  %v130_v14 = vadd.s32 %v548_v57, %v546_v56  ;;  %vm76_vm8 = vcmp.lt.s32.totalorder %v525_v2, 0  ;;  %vm75_vm9 = vcmp.le.f32.partialorder %v74_v7, 0.7853982 }
  0x44   :  { %vm166_vm1 = vweird.f32 %v525_v2  ;;  %s486_s4 = smov [#allocation10]  }
  0x45   :  { %v135_v4 = vadd.s32 536870912, %v134_v3  ;;  %s314_s6 = sshll.u32 %s486_s4, 4  ;;  %s315_s6 = int_to_ptr.vmem [resolvable:$true] %s314_s6 }
  0x46   :  { %s448_s7 = scalar_lea.vmem %s315_s6, 128  ;;  %p453_p7 = scmp.lt.s32.totalorder %s315_s6, %s315_s6 }
  0x47   :  { %v136_v5 = vshrl.u32 %v135_v4, 30  ;;  %p449_p6 = scmp.ne.s32.totalorder %s315_s6, %s448_s7  ;;  %p454_p8 = scmp.lt.s32.totalorder %s448_s7, %s448_s7 }
  0x49   :  { %v137_v6 = vshll.u32 %v136_v5, 30  ;;  %v160_v27 = vsub.s32 4, %v136_v5  ;;  %p455_p9 = por %p454_p8, %p453_p7 }
  0x4b   :  { %v138_v9 = vsub.s32 %v134_v3, %v137_v6  ;;  %v161_v30 = vsel %vm76_vm8, %v160_v27, %v136_v5  ;;  %p456_p10 = pnand %p455_p9, %p449_p6 }
  0x4c   :  { %v163_v32 = vsel %vm75_vm9, 0, %v161_v30 }
  0x4d   :  { %v140_v10 = vsub.s32 0, %v138_v9  ;;  %v270_v33 = vadd.s32 3, %v163_v32  ;;  %v167_v34 = vand.u32 3, %v163_v32 }
  0x4f   :  { %v339_v11 = vmin.u32 %v140_v10, %v138_v9  ;;  %v271_v35 = vand.u32 3, %v270_v33  ;;  %vm172_vm10 = vcmp.eq.s32.totalorder %v167_v34, 2  ;;  %vm169_vm12 = vcmp.eq.s32.totalorder %v167_v34, 0 }
  0x50   :  { %vm168_vm14 = vcmp.lt.s32.totalorder %v167_v34, 2 }
  0x51   :  { %v142_v12 = vclz %v339_v11  ;;  %vm276_vm11 = vcmp.eq.s32.totalorder %v271_v35, 2  ;;  %vm273_vm13 = vcmp.eq.s32.totalorder %v271_v35, 0  ;;  %vm272_vm15 = vcmp.lt.s32.totalorder %v271_v35, 2 }
  0x53   :  { %v340_v13 = vadd.s32 4294967294, %v142_v12 }
  0x55   :  { %vm341_vm7 = vcmp.lt.s32.totalorder %v340_v13, 0 }
  0x56   :  { %v145_v15 = vsel %vm341_vm7, 0, %v340_v13 }
  0x57   :  { %v146_v16 = vsub.s32 32, %v145_v15  ;;  %v147_v17 = vshll.u32 %v138_v9, %v145_v15  ;;  %v150_v18 = vsub.s32 4294967266, %v145_v15 }
  0x59   :  { %v148_v19 = vshrl.u32 %v130_v14, %v146_v16  ;;  %v151_v20 = vadd.s32 127, %v150_v18 }
  0x5b   :  { %v149_v21 = vor.u32 %v148_v19, %v147_v17  ;;  %v152_v22 = vshll.u32 %v151_v20, 23 }
  0x5d   :  { %v153_v23 = vor.u32 4788187, %v152_v22  ;;  %v156_v24 = vcvt.s32.f32 %v149_v21 }
  0x5f   :  { %v154_v25 = vand.u32 2147483647, %v153_v23 }
  0x61   :  { %v157_v26 = vmul.f32 %v156_v24, %v154_v25 }
  0x63   :  { %v158_v28 = vxor.u32 2147483648, %v157_v26 }
  0x65   :  { %v159_v29 = vsel %vm76_vm8, %v158_v28, %v157_v26 }
  0x66   :  { %v162_v31 = vsel %vm75_vm9, %v525_v2, %v159_v29 }
  0x67   :  { %364 = vcosq.f32 %v162_v31 }
  0x68   :  { %366 = vsinq.f32 %v162_v31 }
  0x74   :  { %v365_v36 = vpop.eup %364 }
  0x75   :  { %v367_v37 = vpop.eup %366  ;;  %v173_v38 = vxor.u32 2147483648, %v365_v36 }
  0x76   :  { %v170_v7 = vxor.u32 2147483648, %v367_v37 }
  0x77   :  { %v174_v39 = vsel %vm172_vm10, %v173_v38, %v367_v37  ;;  %v278_v40 = vsel %vm276_vm11, %v173_v38, %v367_v37 }
  0x78   :  { %v171_v41 = vsel %vm169_vm12, %v365_v36, %v170_v7  ;;  %v275_v42 = vsel %vm273_vm13, %v365_v36, %v170_v7 }
  0x79   :  { %v175_v43 = vsel %vm168_vm14, %v171_v41, %v174_v39  ;;  %v279_v44 = vsel %vm272_vm15, %v275_v42, %v278_v40 }
  0x7a   :  { %v176_v45 = vsel %vm166_vm1, nan, %v175_v43  ;;  %v280_v46 = vsel %vm166_vm1, nan, %v279_v44 }
  0x7b   :  { %v288_v47 = vmul.f32 %v176_v45, %v523_v1  ;;  %v289_v49 = vmul.f32 %v280_v46, %v521_v0 }
  0x7d   :  { %v290_v50 = vadd.f32 %v289_v49, %v288_v47 }
  0x7f   :  { %v291_v51 = vmul.f32 %v541_v48, %v290_v50 }
  0x81   :  { %v292_v2 = vsel %vm284_vm0, %v291_v51, %v176_v45 }
  0x82   :  { %305 = vst [vmem:[#allocation10] sm:$0xff] %v292_v2 }
  0x83   :  { %459 = shalt.err (!%p456_p10)
}
  0x84   :  { %317 = dma.vmem_to_hbm [thread:$0]  %s315_s6, 128, %s574_s3, [#allocation6]  }
  0x85   :  { %472 = dma.done.wait [#allocation6], 128  }
  0x86   :  { %473 = vsyncadd [#allocation6], 4294967168 }
  0x87   :  { %474 = dma.done.wait [#allocation12], 128  }
  0x88   :  { %475 = vsyncadd [#allocation12], 4294967168 }
  0x89   :  { %334 = vsyncpa [#allocation5], 1 }
  0x8a   :  { %335 = vsyncpa [#allocation8], 1 }
  0x8b   :  { %336 = vsyncpa [#allocation6], 1 }
  0x8c   :  { %337 = vsyncpa [#allocation12], 1 }

</bundles_post_ra>
